<compile_context>
chip_gen: v6e
topology: v6e:2x2x1
jax: 0.10.0
libtpu: 0.0.40
codegen_flags: <defaults>
</compile_context>

<pallas_src>
import functools

import jax
import jax.numpy as jnp
from jax.experimental import pallas as pl
from jax.experimental.pallas import tpu as pltpu


def _align8(n):
    return -(-n // 8) * 8


def _slab_layout(n_obs, H, L):
    """8-aligned row offsets of each section in the packed weight slab."""
    xb = 0                        # w_xb : (n_obs, 4H)  emb@W_ih^T + (b_ih+b_hh)
    hh = xb + _align8(n_obs)      # w_hh : (H, 4H)      W_hh^T
    w1 = hh + _align8(H)          # w1   : (H, L)       q1_w^T
    b1 = w1 + _align8(H)          # b1   : (1, L)
    w2 = b1 + 8                   # w2   : (L, qpad)    q2_w^T zero-padded
    b2 = w2 + _align8(L)          # b2   : (1, qpad)
    rows = b2 + 8
    return dict(xb=xb, hh=hh, w1=w1, b1=b1, w2=w2, b2=b2, rows=rows)


def prepare_params(params):
    """One-time weight prep: fold embedding + LSTM biases into the gate weights,
    permute gate columns, transpose the Q-net weights, pack into one slab."""
    emb = params["embedding"].astype(jnp.float32)            # (n_obs, H)
    n_obs, H = emb.shape
    A, L = params["q2_w"].shape                               # (n_actions, L)

    wih_t = params["lstm_w_ih"].astype(jnp.float32).T         # (H, 4H)
    whh_t = params["lstm_w_hh"].astype(jnp.float32).T         # (H, 4H)
    b = (params["lstm_b_ih"] + params["lstm_b_hh"]).astype(jnp.float32)

    # onehot(x) @ (emb @ W_ih^T + b) == emb[x] @ W_ih^T + b   (one-hot sums to 1)
    w_xb = emb @ wih_t + b.reshape(1, 4 * H)                   # (n_obs, 4H)

    def perm_gates(w):  # [i, f, g, o] -> [i, f, o, g]: one contiguous sigmoid
        return jnp.concatenate(
            [w[..., :2 * H], w[..., 3 * H:], w[..., 2 * H:3 * H]], axis=-1)

    w_xb = perm_gates(w_xb)
    w_hh = perm_gates(whh_t)

    out_w = 128 * (-(-(2 * H + A) // 128))   # lane-dense packed output width
    qpad = out_w - 2 * H
    width = 128 * (-(-max(4 * H, L, qpad) // 128))

    lay = _slab_layout(n_obs, H, L)
    slab = jnp.zeros((lay["rows"], width), jnp.float32)
    slab = slab.at[lay["xb"]:lay["xb"] + n_obs, :4 * H].set(w_xb)
    slab = slab.at[lay["hh"]:lay["hh"] + H, :4 * H].set(w_hh)
    slab = slab.at[lay["w1"]:lay["w1"] + H, :L].set(
        params["q1_w"].astype(jnp.float32).T)
    slab = slab.at[lay["b1"], :L].set(params["q1_b"].astype(jnp.float32))
    slab = slab.at[lay["w2"]:lay["w2"] + L, :A].set(
        params["q2_w"].astype(jnp.float32).T)
    slab = slab.at[lay["b2"], :A].set(params["q2_b"].astype(jnp.float32))

    return {"slab": slab, "n_obs": int(n_obs), "H": int(H), "L": int(L),
            "A": int(A), "out_w": int(out_w)}


@functools.partial(jax.jit, static_argnames=("n_obs", "H", "L", "A", "out_w"))
def _drqn_apply(x_seq, h0, c0, slab, *, n_obs, H, L, A, out_w):
    """x_seq: (T, B) int32.  Returns (q_seq (T,B,A), h_T (B,H), c_T (B,H))."""
    T, B = x_seq.shape
    qpad = out_w - 2 * H
    rows, width = slab.shape
    lay = _slab_layout(n_obs, H, L)

    def kernel(x_ref, state0_ref, slab_ref, out_ref, h_scr, c_scr):
        t = pl.program_id(0)

        @pl.when(t == 0)
        def _():
            h_scr[...] = state0_ref[:, :H]
            c_scr[...] = state0_ref[:, H:]

        # Embedding "gather" as one-hot compare (VPU); the gather itself plus
        # the summed LSTM bias are folded into the w_xb rows at prep time.
        idx = x_ref[0]                                          # (B, 1) int32
        iota = jax.lax.broadcasted_iota(jnp.int32, (B, n_obs), 1)
        onehot = (iota == idx).astype(jnp.float32)              # (B, n_obs)

        h_prev = h_scr[...]
        c_prev = c_scr[...]

        # Two accumulating MXU dots (no lane-offset concat of [onehot | h]).
        w_xb = slab_ref[lay["xb"]:lay["xb"] + n_obs, :4 * H]
        w_hh = slab_ref[lay["hh"]:lay["hh"] + H, :4 * H]
        gates = (jnp.dot(onehot, w_xb, preferred_element_type=jnp.float32)
                 + jnp.dot(h_prev, w_hh, preferred_element_type=jnp.float32))

        # Gate columns were permuted to [i, f, o, g] at prep time:
        # one contiguous sigmoid over 3H lanes + one tanh over H lanes.
        sig = jax.nn.sigmoid(gates[:, :3 * H])
        i_g = sig[:, 0 * H:1 * H]
        f_g = sig[:, 1 * H:2 * H]
        o_g = sig[:, 2 * H:3 * H]
        g_g = jnp.tanh(gates[:, 3 * H:4 * H])

        c_t = f_g * c_prev + i_g * g_g
        h_t = o_g * jnp.tanh(c_t)

        # Q-network: Linear -> ReLU -> Linear (q2 pre-padded to qpad lanes).
        w1 = slab_ref[lay["w1"]:lay["w1"] + H, :L]
        b1 = slab_ref[lay["b1"]:lay["b1"] + 1, :L]
        h1 = jnp.maximum(
            jnp.dot(h_t, w1, preferred_element_type=jnp.float32) + b1, 0.0)
        w2 = slab_ref[lay["w2"]:lay["w2"] + L, :qpad]
        b2 = slab_ref[lay["b2"]:lay["b2"] + 1, :qpad]
        q = jnp.dot(h1, w2, preferred_element_type=jnp.float32) + b2

        # Carry state in scratch; one packed lane-dense store: [h | c | q_pad].
        h_scr[...] = h_t
        c_scr[...] = c_t
        out_ref[0] = jnp.concatenate([h_t, c_t, q], axis=1)

    state0 = jnp.concatenate([h0, c0], axis=1)                  # (B, 2H)

    packed = pl.pallas_call(
        kernel,
        out_shape=jax.ShapeDtypeStruct((T, B, out_w), jnp.float32),
        grid_spec=pltpu.PrefetchScalarGridSpec(
            num_scalar_prefetch=0,
            grid=(T,),
            in_specs=[
                pl.BlockSpec((1, B, 1), lambda t: (t, 0, 0)),      # x per step
                pl.BlockSpec((B, 2 * H), lambda t: (0, 0)),        # init state (resident)
                pl.BlockSpec((rows, width), lambda t: (0, 0)),     # weight slab (resident)
            ],
            out_specs=pl.BlockSpec((1, B, out_w), lambda t: (t, 0, 0)),
            scratch_shapes=[pltpu.VMEM((B, H), jnp.float32),       # h carry
                            pltpu.VMEM((B, H), jnp.float32)],      # c carry
        ),
        compiler_params=pltpu.CompilerParams(
            dimension_semantics=("arbitrary",)),   # sequential recurrence over T
    )(x_seq.reshape(T, B, 1).astype(jnp.int32), state0, slab)

    q_seq = packed[:, :, 2 * H:2 * H + A]
    return q_seq, packed[-1, :, :H], packed[-1, :, H:2 * H]


def drqn_rollout(x_seq, prep, last_state=None):
    """Multi-step rollout: x_seq (T, B) int32 -> (Q_seq (T,B,A), [(h_T, c_T)])."""
    T, B = x_seq.shape
    H = prep["H"]
    if last_state is None:
        h0 = jnp.zeros((B, H), jnp.float32)
        c0 = jnp.zeros((B, H), jnp.float32)
    else:
        h0, c0 = last_state
    q_seq, h_t, c_t = _drqn_apply(
        x_seq, h0, c0, prep["slab"],
        n_obs=prep["n_obs"], H=H, L=prep["L"], A=prep["A"], out_w=prep["out_w"])
    return q_seq, [(h_t, c_t)]


def drqn_forward(x, prep, last_state=None):
    """Single-step forward (matches DRQN_model.forward): x (B,) int32."""
    q_seq, states = drqn_rollout(x[None, :], prep, last_state)
    return q_seq[0], states


def drqn_reference(x, params, last_state=None):
    """Pure-JAX reference (matches PyTorch semantics) for validation."""
    B = x.shape[0]
    emb = params["embedding"]
    H = emb.shape[1]
    if last_state is None:
        h_prev = jnp.zeros((B, H), jnp.float32)
        c_prev = jnp.zeros((B, H), jnp.float32)
    else:
        h_prev, c_prev = last_state
    hin = emb[x]
    gates = (hin @ params["lstm_w_ih"].T + params["lstm_b_ih"]
             + h_prev @ params["lstm_w_hh"].T + params["lstm_b_hh"])
    i_g = jax.nn.sigmoid(gates[:, 0 * H:1 * H])
    f_g = jax.nn.sigmoid(gates[:, 1 * H:2 * H])
    g_g = jnp.tanh(gates[:, 2 * H:3 * H])
    o_g = jax.nn.sigmoid(gates[:, 3 * H:4 * H])
    c_t = f_g * c_prev + i_g * g_g
    h_t = o_g * jnp.tanh(c_t)
    h1 = jax.nn.relu(h_t @ params["q1_w"].T + params["q1_b"])
    q = h1 @ params["q2_w"].T + params["q2_b"]
    return q, [(h_t, c_t)]


def init_params(key, n_obs, n_actions, H, L):
    ks = jax.random.split(key, 9)
    u = lambda k, shape, s: jax.random.uniform(k, shape, jnp.float32, -s, s)
    s = 1.0 / jnp.sqrt(H)
    return {
        "embedding": jax.random.normal(ks[0], (n_obs, H), jnp.float32),
        "lstm_w_ih": u(ks[1], (4 * H, H), s),
        "lstm_w_hh": u(ks[2], (4 * H, H), s),
        "lstm_b_ih": u(ks[3], (4 * H,), s),
        "lstm_b_hh": u(ks[4], (4 * H,), s),
        "q1_w": u(ks[5], (L, H), s),
        "q1_b": u(ks[6], (L,), s),
        "q2_w": u(ks[7], (n_actions, L), 1.0 / jnp.sqrt(L)),
        "q2_b": u(ks[8], (n_actions,), 1.0 / jnp.sqrt(L)),
    }


if __name__ == "__main__":
    key = jax.random.PRNGKey(0)
    B, n_obs, n_actions, H, L, T = 8, 16, 4, 32, 32, 8

    pkey, xkey, skey = jax.random.split(key, 3)
    params = init_params(pkey, n_obs, n_actions, H, L)
    prep = prepare_params(params)          # one-time weight prep (hoisted)
    x = jax.random.randint(xkey, (B,), 0, n_obs, jnp.int32)

    # --- Single-step forward, fresh state (module forward, T=1 case) ---
    q, states = drqn_forward(x, prep)
    jax.block_until_ready(q)
    q_ref, states_ref = drqn_reference(x, params)
    assert jnp.allclose(q, q_ref, atol=1e-5, rtol=1e-5)
    assert jnp.allclose(states[0][0], states_ref[0][0], atol=1e-5, rtol=1e-5)
    assert jnp.allclose(states[0][1], states_ref[0][1], atol=1e-5, rtol=1e-5)

    # --- Single-step forward with carried state ---
    q2, states2 = drqn_forward(x, prep, last_state=states[0])
    jax.block_until_ready(q2)
    q2_ref, states2_ref = drqn_reference(x, params, last_state=states_ref[0])
    assert jnp.allclose(q2, q2_ref, atol=1e-5, rtol=1e-5)
    assert jnp.allclose(states2[0][0], states2_ref[0][0], atol=1e-5, rtol=1e-5)
    assert jnp.allclose(states2[0][1], states2_ref[0][1], atol=1e-5, rtol=1e-5)

    # --- Multi-step rollout: T grid axis, weights resident, state in scratch ---
    x_seq = jax.random.randint(skey, (T, B), 0, n_obs, jnp.int32)
    q_seq, states_T = drqn_rollout(x_seq, prep)
    jax.block_until_ready(q_seq)
    st = None
    for t in range(T):
        q_ref_t, st_list = drqn_reference(x_seq[t], params, last_state=st)
        st = st_list[0]
        # Slightly looser tolerance: summation-order differences accumulate
        # over the recurrence (embedding/bias fold done once at prep time).
        assert jnp.allclose(q_seq[t], q_ref_t, atol=1e-4, rtol=1e-4)
    assert jnp.allclose(states_T[0][0], st[0], atol=1e-4, rtol=1e-4)
    assert jnp.allclose(states_T[0][1], st[1], atol=1e-4, rtol=1e-4)

    print("KERNEL_OK")
</pallas_src>

<mosaic_0001>
module attributes {stable_mosaic.version = 11 : i64} {
  func.func @kernel(%arg0: i32, %arg1: memref<1x8x1xi32, #tpu.memory_space<vmem>>, %arg2: memref<8x64xf32, #tpu.memory_space<vmem>>, %arg3: memref<128x128xf32, #tpu.memory_space<vmem>>, %arg4: memref<1x8x128xf32, #tpu.memory_space<vmem>>, %arg5: memref<8x32xf32, #tpu.memory_space<vmem>>, %arg6: memref<8x32xf32, #tpu.memory_space<vmem>>) attributes {dimension_semantics = [#tpu.dimension_semantics<arbitrary>], iteration_bounds = array<i64: 1>, scalar_prefetch = 0 : i64, scratch_operands = 2 : i64, tpu.core_type = #tpu.core_type<tc>, window_params = [{transform_indices = @transform_0, window_bounds = array<i64: 1, 8, 1>}, {pipeline_mode = #tpu.pipeline_mode<synchronous>, transform_indices = @transform_1, window_bounds = array<i64: 8, 64>}, {pipeline_mode = #tpu.pipeline_mode<synchronous>, transform_indices = @transform_2, window_bounds = array<i64: 128, 128>}, {transform_indices = @transform_3, window_bounds = array<i64: 1, 8, 128>}]} {
    %c0_i32 = arith.constant 0 : i32
    %0 = arith.cmpi eq, %arg0, %c0_i32 : i32
    %1 = arith.extui %0 : i1 to i32
    %c0_i32_0 = arith.constant 0 : i32
    %2 = arith.cmpi ne, %1, %c0_i32_0 : i32
    scf.if %2 {
      %c0_26 = arith.constant 0 : index
      %c0_27 = arith.constant 0 : index
      %51 = vector.load %arg2[%c0_26, %c0_27] : memref<8x64xf32, #tpu.memory_space<vmem>>, vector<8x32xf32>
      %c0_28 = arith.constant 0 : index
      %c0_29 = arith.constant 0 : index
      %52 = vector.load %arg5[%c0_28, %c0_29] : memref<8x32xf32, #tpu.memory_space<vmem>>, vector<8x32xf32>
      tpu.vector_store %arg5[%c0_28, %c0_29], %51 {strides = array<i32>} : memref<8x32xf32, #tpu.memory_space<vmem>>, vector<8x32xf32>,
      %c0_30 = arith.constant 0 : index
      %c32 = arith.constant 32 : index
      %53 = vector.load %arg2[%c0_30, %c32] : memref<8x64xf32, #tpu.memory_space<vmem>>, vector<8x32xf32>
      %c0_31 = arith.constant 0 : index
      %c0_32 = arith.constant 0 : index
      %54 = vector.load %arg6[%c0_31, %c0_32] : memref<8x32xf32, #tpu.memory_space<vmem>>, vector<8x32xf32>
      tpu.vector_store %arg6[%c0_31, %c0_32], %53 {strides = array<i32>} : memref<8x32xf32, #tpu.memory_space<vmem>>, vector<8x32xf32>,
    } else {
    }
    %c0 = arith.constant 0 : index
    %c0_1 = arith.constant 0 : index
    %c0_2 = arith.constant 0 : index
    %3 = vector.load %arg1[%c0, %c0_1, %c0_2] : memref<1x8x1xi32, #tpu.memory_space<vmem>>, vector<1x8x1xi32>
    %4 = vector.shape_cast %3 : vector<1x8x1xi32> to vector<8x1xi32>
    %5 = tpu.iota {dimensions = array<i32: 1>} : vector<8x16xi32>
    %6 = vector.broadcast %4 : vector<8x1xi32> to vector<8x16xi32>
    %7 = arith.cmpi eq, %5, %6 : vector<8x16xi32>
    %8 = arith.extui %7 : vector<8x16xi1> to vector<8x16xi32>
    %9 = arith.sitofp %8 : vector<8x16xi32> to vector<8x16xf32>
    %c0_3 = arith.constant 0 : index
    %c0_4 = arith.constant 0 : index
    %10 = vector.load %arg5[%c0_3, %c0_4] : memref<8x32xf32, #tpu.memory_space<vmem>>, vector<8x32xf32>
    %c0_5 = arith.constant 0 : index
    %c0_6 = arith.constant 0 : index
    %11 = vector.load %arg6[%c0_5, %c0_6] : memref<8x32xf32, #tpu.memory_space<vmem>>, vector<8x32xf32>
    %c0_7 = arith.constant 0 : index
    %c0_8 = arith.constant 0 : index
    %12 = vector.load %arg3[%c0_7, %c0_8] : memref<128x128xf32, #tpu.memory_space<vmem>>, vector<16x128xf32>
    %c16 = arith.constant 16 : index
    %c0_9 = arith.constant 0 : index
    %13 = vector.load %arg3[%c16, %c0_9] : memref<128x128xf32, #tpu.memory_space<vmem>>, vector<32x128xf32>
    %cst = arith.constant dense<0.000000e+00> : vector<8x128xf32>
    %14 = tpu.matmul %9, %12, %cst {dimension_numbers = #tpu.dot_dimension_numbers<[1], [0], [0], [1], [0, 0, 1, 1], [], []>} : vector<8x16xf32>, vector<16x128xf32>, vector<8x128xf32> -> vector<8x128xf32>
    %cst_10 = arith.constant dense<0.000000e+00> : vector<8x128xf32>
    %15 = tpu.matmul %10, %13, %cst_10 {dimension_numbers = #tpu.dot_dimension_numbers<[1], [0], [0], [1], [0, 0, 1, 1], [], []>} : vector<8x32xf32>, vector<32x128xf32>, vector<8x128xf32> -> vector<8x128xf32>
    %16 = arith.addf %14, %15 : vector<8x128xf32>
    %17 = vector.extract_strided_slice %16 {offsets = [0, 0], sizes = [8, 96], strides = [1, 1]} : vector<8x128xf32> to vector<8x96xf32>
    %18 = arith.negf %17 : vector<8x96xf32>
    %19 = math.exp %18 : vector<8x96xf32>
    %cst_11 = arith.constant 1.000000e+00 : f32
    %20 = vector.broadcast %cst_11 : f32 to vector<8x96xf32>
    %21 = arith.addf %20, %19 : vector<8x96xf32>
    %22 = arith.divf %20, %21 : vector<8x96xf32>
    %23 = vector.extract_strided_slice %22 {offsets = [0, 0], sizes = [8, 32], strides = [1, 1]} : vector<8x96xf32> to vector<8x32xf32>
    %24 = vector.extract_strided_slice %22 {offsets = [0, 32], sizes = [8, 32], strides = [1, 1]} : vector<8x96xf32> to vector<8x32xf32>
    %25 = vector.extract_strided_slice %22 {offsets = [0, 64], sizes = [8, 32], strides = [1, 1]} : vector<8x96xf32> to vector<8x32xf32>
    %26 = vector.extract_strided_slice %16 {offsets = [0, 96], sizes = [8, 32], strides = [1, 1]} : vector<8x128xf32> to vector<8x32xf32>
    %27 = math.tanh %26 : vector<8x32xf32>
    %28 = arith.mulf %24, %11 : vector<8x32xf32>
    %29 = arith.mulf %23, %27 : vector<8x32xf32>
    %30 = arith.addf %28, %29 : vector<8x32xf32>
    %31 = math.tanh %30 : vector<8x32xf32>
    %32 = arith.mulf %25, %31 : vector<8x32xf32>
    %c48 = arith.constant 48 : index
    %c0_12 = arith.constant 0 : index
    %33 = vector.load %arg3[%c48, %c0_12] : memref<128x128xf32, #tpu.memory_space<vmem>>, vector<32x32xf32>
    %c80 = arith.constant 80 : index
    %c0_13 = arith.constant 0 : index
    %34 = vector.load %arg3[%c80, %c0_13] : memref<128x128xf32, #tpu.memory_space<vmem>>, vector<1x32xf32>
    %cst_14 = arith.constant dense<0.000000e+00> : vector<8x32xf32>
    %35 = tpu.matmul %32, %33, %cst_14 {dimension_numbers = #tpu.dot_dimension_numbers<[1], [0], [0], [1], [0, 0, 1, 1], [], []>} : vector<8x32xf32>, vector<32x32xf32>, vector<8x32xf32> -> vector<8x32xf32>
    %36 = vector.broadcast %34 : vector<1x32xf32> to vector<8x32xf32>
    %37 = arith.addf %35, %36 : vector<8x32xf32>
    %cst_15 = arith.constant 0.000000e+00 : f32
    %38 = vector.broadcast %cst_15 : f32 to vector<8x32xf32>
    %39 = arith.maximumf %37, %38 : vector<8x32xf32>
    %c88 = arith.constant 88 : index
    %c0_16 = arith.constant 0 : index
    %40 = vector.load %arg3[%c88, %c0_16] : memref<128x128xf32, #tpu.memory_space<vmem>>, vector<32x64xf32>
    %c120 = arith.constant 120 : index
    %c0_17 = arith.constant 0 : index
    %41 = vector.load %arg3[%c120, %c0_17] : memref<128x128xf32, #tpu.memory_space<vmem>>, vector<1x64xf32>
    %cst_18 = arith.constant dense<0.000000e+00> : vector<8x64xf32>
    %42 = tpu.matmul %39, %40, %cst_18 {dimension_numbers = #tpu.dot_dimension_numbers<[1], [0], [0], [1], [0, 0, 1, 1], [], []>} : vector<8x32xf32>, vector<32x64xf32>, vector<8x64xf32> -> vector<8x64xf32>
    %43 = vector.broadcast %41 : vector<1x64xf32> to vector<8x64xf32>
    %44 = arith.addf %42, %43 : vector<8x64xf32>
    %c0_19 = arith.constant 0 : index
    %c0_20 = arith.constant 0 : index
    %45 = vector.load %arg5[%c0_19, %c0_20] : memref<8x32xf32, #tpu.memory_space<vmem>>, vector<8x32xf32>
    tpu.vector_store %arg5[%c0_19, %c0_20], %32 {strides = array<i32>} : memref<8x32xf32, #tpu.memory_space<vmem>>, vector<8x32xf32>,
    %c0_21 = arith.constant 0 : index
    %c0_22 = arith.constant 0 : index
    %46 = vector.load %arg6[%c0_21, %c0_22] : memref<8x32xf32, #tpu.memory_space<vmem>>, vector<8x32xf32>
    tpu.vector_store %arg6[%c0_21, %c0_22], %30 {strides = array<i32>} : memref<8x32xf32, #tpu.memory_space<vmem>>, vector<8x32xf32>,
    %47 = tpu.concatenate %32, %30, %44 in 1 : vector<8x32xf32>, vector<8x32xf32>, vector<8x64xf32> -> vector<8x128xf32>
    %c0_23 = arith.constant 0 : index
    %c0_24 = arith.constant 0 : index
    %c0_25 = arith.constant 0 : index
    %48 = vector.load %arg4[%c0_23, %c0_24, %c0_25] : memref<1x8x128xf32, #tpu.memory_space<vmem>>, vector<1x8x128xf32>
    %49 = vector.shape_cast %48 : vector<1x8x128xf32> to vector<8x128xf32>
    %50 = vector.shape_cast %47 : vector<8x128xf32> to vector<1x8x128xf32>
    tpu.vector_store %arg4[%c0_23, %c0_24, %c0_25], %50 {strides = array<i32>} : memref<1x8x128xf32, #tpu.memory_space<vmem>>, vector<1x8x128xf32>,
    return
  }
  func.func @transform_0(%arg0: i32) -> (i32, i32, i32) {
    %c0_i32 = arith.constant 0 : i32
    %c0_i32_0 = arith.constant 0 : i32
    %c0_i32_1 = arith.constant 0 : i32
    return %arg0, %c0_i32, %c0_i32_0 : i32, i32, i32
  }
  func.func @transform_1(%arg0: i32) -> (i32, i32) {
    %c0_i32 = arith.constant 0 : i32
    %c0_i32_0 = arith.constant 0 : i32
    %c0_i32_1 = arith.constant 0 : i32
    return %c0_i32, %c0_i32_0 : i32, i32
  }
  func.func @transform_2(%arg0: i32) -> (i32, i32) {
    %c0_i32 = arith.constant 0 : i32
    %c0_i32_0 = arith.constant 0 : i32
    %c0_i32_1 = arith.constant 0 : i32
    return %c0_i32, %c0_i32_0 : i32, i32
  }
  func.func @transform_3(%arg0: i32) -> (i32, i32, i32) {
    %c0_i32 = arith.constant 0 : i32
    %c0_i32_0 = arith.constant 0 : i32
    %c0_i32_1 = arith.constant 0 : i32
    return %arg0, %c0_i32, %c0_i32_0 : i32, i32, i32
  }
}

</mosaic_0001>

<bundles_post_ra>
// kernel: _drqn_apply.1
= control target key start
LH: loop header
LB: loop body
LE: loop exit
PB: predicated region body
PF: predicated region fallthrough
CT: control target
= control target key end

     0   :  { %8 = vsyncpa [#allocation5], 0  ;;  %s527_s12 = smov [#allocation4]   ;;  %s601_s0 = inlined_call_operand.vmem [shape: s32[1,8,1], index: 0, kind: input, shape index: {}]   ;;  %s602_s1 = inlined_call_operand.vmem [shape: f32[8,64], index: 1, kind: input, shape index: {}]   ;;  %s603_s2 = inlined_call_operand.hbm [shape: f32[128,128], index: 2, kind: input, shape index: {}]   ;;  %s604_s3 = inlined_call_operand.vmem [shape: f32[1,8,128], index: 3, kind: output, shape index: {}]  }
   0x1   :  { %s18_s13 = sshll.u32 %s527_s12, 4  ;;  %s19_s13 = int_to_ptr.vmem [resolvable:$true] %s18_s13 }
   0x2   :  { %s513_s14 = scalar_lea.vmem %s19_s13, 2048  ;;  %p518_p1 = scmp.lt.s32.totalorder %s19_s13, %s19_s13 }
   0x3   :  { %p514_p0 = scmp.ne.s32.totalorder %s19_s13, %s513_s14  ;;  %p519_p2 = scmp.lt.s32.totalorder %s513_s14, %s513_s14 }
   0x5   :  { %p520_p3 = por %p519_p2, %p518_p1 }
   0x7   :  { %p521_p4 = pnand %p520_p3, %p514_p0 }
   0x9   :  { %524 = shalt.err (!%p521_p4)
}
   0xa   :  { %s528_s15 = smov 128   ;;  %s529_s16 = smov 8  }
   0xb   :  { %24 = dma.hbm_to_vmem [thread:$0]  %s603_s2, 2048, %s19_s13, [#allocation5], %s528_s15, %s528_s15, %s529_s16  }
   0xc   :  { %525 = dma.done.wait [#allocation5], 2048  }
   0xd   :  { %526 = vsyncadd [#allocation5], 4294965248  ;;  %v530_v0 = vmov 0   ;;  %v531_v1 = vmov 0.0   ;;  %vm532_vm0 = vmmov 0   ;;  %v41_v2 = vld [vmem:[%s601_s0] sm:$0xff]  ;;  %v42_v11 = vlaneseq }
   0xe   :  { %496 = vset.pattern.permute.xlu0 %v530_v0  ;;  %447 = vmatprep.subr.mxu0 %v531_v1  ;;  %v57_v3 = vld [vmem:[#allocation4 + $0x28] sm:$0xff]  ;;  %v56_v4 = vld [vmem:[#allocation4 + $0x20] sm:$0xff]  ;;  %vm33_vm1 = vcmask 261120   ;;  %v55_v6 = vld [vmem:[#allocation4 + $0x18] sm:$0xff]  ;;  %s533_s0 = smov 96   ;;  %vm132_vm2 = vcmask 130048  }
   0xf   :  { %458 = vmatprep.subr.mxu1 %v531_v1  ;;  %455 = vmatprep.mubr.msk.f32.mxu0 %vm532_vm0, %v531_v1  ;;  %v53_v5 = vld [vmem:[#allocation4 + $0x8] sm:$0xff]  ;;  %v32_v7 = vld [vmem:[%s602_s1] sm:$0xff]  ;;  %v52_v8 = vld [vmem:[#allocation4] sm:$0xff]  ;;  %v43_v12 = vand.u32 127, %v42_v11  ;;  %s534_s1 = smov 32   ;;  %s535_s22 = smov 64  }
  0x10   :  { %462 = vmatprep.mubr.msk.f32.mxu1 %vm532_vm0, %v531_v1  ;;  %45 = vperm.xlu0 %496, %v41_v2   ;;  %34 = vst.msk [vmem:[#allocation2] sm:$0xff] %vm33_vm1, %v32_v7  ;;  %v54_v9 = vld [vmem:[#allocation4 + $0x10] sm:$0xff]  ;;  %v237_v33 = vld [vmem:[#allocation4 + $0x48] sm:$0xff]  ;;  %v236_v34 = vld [vmem:[#allocation4 + $0x40] sm:$0xff]  ;;  %vm413_vm4 = vcmask 523264  }
  0x11   :  { %448 = vmatpush3.msra.mxu0 %v57_v3  ;;  %459 = vmatpush3.msra.mxu1 %v53_v5  ;;  %v235_v35 = vld [vmem:[#allocation4 + $0x38] sm:$0xff]  ;;  %v234_v36 = vld [vmem:[#allocation4 + $0x30] sm:$0xff]  ;;  %v321_v43 = vld [vmem:[#allocation4 + $0x68] sm:$0xff] }
  0x12   :  { %449 = vmatprep.subr.mxu0 %v531_v1  ;;  %460 = vmatprep.subr.mxu1 %v531_v1  ;;  %v322_v38 = vld [vmem:[#allocation4 + $0x70] sm:$0xff]  ;;  %v320_v44 = vld [vmem:[#allocation4 + $0x60] sm:$0xff]  ;;  %v319_v45 = vld [vmem:[#allocation4 + $0x58] sm:$0xff] }
  0x13   :  { %450 = vmatpush3.msra.mxu0 %v56_v4  ;;  %461 = vmatpush3.msra.mxu1 %v52_v8  ;;  %v425_v46 = vld [vmem:[#allocation4 + $0x50] ss:$0 sm:$0xff]  ;;  %v427_v51 = vld [vmem:[#allocation4 + $0x78] ss:$0 sm:$0xff] }
  0x14   :  { %451 = vmatprep.subr.mxu0 %v531_v1  ;;  %37 = vrot.lane.b32.xlu0 %v32_v7, %s533_s0 }
  0x15   :  { %452 = vmatpush3.msra.mxu0 %v55_v6  ;;  %465 = vmatprep.subr.mxu1 %v531_v1 }
  0x16   :  { %453 = vmatprep.subr.mxu0 %v531_v1 }
  0x17   :  { %454 = vmatpush3.msra.mxu0 %v54_v9  ;;  %v50_v10 = vld [vmem:[#allocation2] sm:$0xff] }
  0x18   :  { %476 = vmatprep.subr.mxu0 %v531_v1  ;;  %456 = vmatmul.mubr.msk.f32.vlgmr.msra.gmra.mxu0 %vm33_vm1, %v50_v10 }
  0x19   :  { %484 = vmatprep.mubr.msk.f32.mxu0 %vm532_vm0, %v531_v1  ;;  %477 = vmatpush3.msra.mxu0 %v322_v38 }
  0x1a   :  { %478 = vmatprep.subr.mxu0 %v531_v1 }
  0x1b   :  { %479 = vmatpush3.msra.mxu0 %v321_v43 }
  0x1c   :  { %480 = vmatprep.subr.mxu0 %v531_v1 }
  0x1d   :  { %481 = vmatpush3.msra.mxu0 %v320_v44 }
  0x1e   :  { %482 = vmatprep.subr.mxu0 %v531_v1 }
  0x1f   :  { %483 = vmatpush3.msra.mxu0 %v319_v45 }
  0x8b   :  { %v46_v13 = vpop.permute.xlu0 %45 }
  0x8c   :  { %vm47_vm3 = vcmp.eq.s32.totalorder %v43_v12, %v46_v13 }
  0x8d   :  { %v421_v14 = vsel %vm47_vm3, 1.0, %v531_v1 }
  0x8e   :  { %463 = vmatmul.mubr.msk.f32.vlgmr.msra.gmra.mxu1 %vm132_vm2, %v421_v14 }
  0x8f   :  { %473 = vmatprep.mubr.msk.f32.mxu1 %vm532_vm0, %v531_v1  ;;  %v38_v16 = vpop.permute.xlu0 %37  ;;  %466 = vmatpush3.msra.mxu1 %v237_v33 }
  0x90   :  { %40 = vst.msk [vmem:[#allocation3] sm:$0xff] %vm33_vm1, %v38_v16  ;;  %467 = vmatprep.subr.mxu1 %v531_v1 }
  0x91   :  { %468 = vmatpush3.msra.mxu1 %v236_v34 }
  0x92   :  { %469 = vmatprep.subr.mxu1 %v531_v1 }
  0x93   :  { %470 = vmatpush3.msra.mxu1 %v235_v35 }
  0x94   :  { %471 = vmatprep.subr.mxu1 %v531_v1 }
  0x95   :  { %472 = vmatpush3.msra.mxu1 %v234_v36 }
  0x97   :  { %v51_v22 = vld [vmem:[#allocation3] sm:$0xff] }
  0xd8   :  { %v128_v15 = vpop.f32.mrf.mxu0 }
  0xda   :  { %v457_v17 = vpop.f32.mrf.mxu0 }
 0x14e   :  { %v202_v18 = vpop.f32.mrf.mxu1 }
 0x14f   :  { %v203_v19 = vadd.f32 %v202_v18, %v128_v15 }
 0x150   :  { %v464_v20 = vpop.f32.mrf.mxu1 }
 0x151   :  { %497 = vtanh.f32 %v203_v19  ;;  %v424_v23 = vmul.f32 -1.442695, %v203_v19 }
 0x153   :  { %499 = vpow2.f32 %v424_v23 }
 0x15e   :  { %v498_v21 = vpop.eup %497 }
 0x15f   :  { %219 = vrot.lane.b32.xlu1 %v498_v21, %s534_s1 }
 0x160   :  { %v500_v24 = vpop.eup %499 }
 0x161   :  { %v209_v25 = vadd.f32 1.0, %v500_v24 }
 0x163   :  { %214 = vrot.lane.b32.xlu1 %v51_v22, %s534_s1  ;;  %501 = vrcp.f32 %v209_v25 }
 0x170   :  { %v502_v26 = vpop.eup %501 }
 0x1d1   :  { %v220_v27 = vpop.permute.xlu1 %219 }
 0x1d2   :  { %v222_v28 = vmul.f32 %v502_v26, %v220_v27 }
 0x1d4   :  { %224 = vrot.lane.b32.xlu0 %v222_v28, %s534_s1 }
 0x1d5   :  { %v215_v29 = vpop.permute.xlu1 %214 }
 0x1d6   :  { %v217_v30 = vmul.f32 %v502_v26, %v215_v29 }
 0x246   :  { %v225_v31 = vpop.permute.xlu0 %224 }
 0x247   :  { %v227_v32 = vadd.f32 %v225_v31, %v217_v30 }
 0x249   :  { %503 = vtanh.f32 %v227_v32 }
 0x256   :  { %v504_v37 = vpop.eup %503 }
 0x257   :  { %230 = vrot.lane.b32.xlu1 %v504_v37, %s534_s1 }
 0x2c9   :  { %v231_v39 = vpop.permute.xlu1 %230 }
 0x2ca   :  { %v233_v40 = vmul.f32 %v502_v26, %v231_v39 }
 0x2cc   :  { %244 = vrot.lane.b32.xlu0 %v233_v40, %s535_s22 }
 0x2d0   :  { %404 = vrot.lane.b32.xlu0 %v227_v32, %s533_s0 }
 0x33e   :  { %v245_v41 = vpop.permute.xlu0 %244 }
 0x33f   :  { %402 = vst.msk [vmem:[#allocation2] sm:$0xff] %vm33_vm1, %v245_v41  ;;  %474 = vmatmul.mubr.msk.f32.vlgmr.msra.gmra.mxu1 %vm33_vm1, %v245_v41  ;;  %v412_v55 = vsel %vm33_vm1, %v245_v41, %v227_v32 }
 0x342   :  { %v405_v42 = vpop.permute.xlu0 %404 }
 0x343   :  { %407 = vst.msk [vmem:[#allocation3] sm:$0xff] %vm33_vm1, %v405_v42 }
 0x3ff   :  { %v314_v47 = vpop.f32.mrf.mxu1 }
 0x400   :  { %v315_v48 = vadd.f32 %v425_v46, %v314_v47 }
 0x401   :  { %v475_v49 = vpop.f32.mrf.mxu1 }
 0x402   :  { %v318_v50 = vmax.f32 %v315_v48, 0.0 }
 0x404   :  { %485 = vmatmul.mubr.msk.f32.vlgmr.msra.gmra.mxu0 %vm33_vm1, %v318_v50 }
 0x4c4   :  { %v397_v52 = vpop.f32.mrf.mxu0 }
 0x4c5   :  { %v398_v53 = vadd.f32 %v427_v51, %v397_v52 }
 0x4c6   :  { %v486_v54 = vpop.f32.mrf.mxu0 }
 0x4c7   :  { %409 = vrot.lane.b32.xlu1 %v398_v53, %s535_s22 }
 0x539   :  { %v410_v56 = vpop.permute.xlu1 %409 }
 0x53a   :  { %v414_v57 = vsel %vm413_vm4, %v412_v55, %v410_v56 }
 0x53b   :  { %415 = vst [vmem:[%s604_s3] sm:$0xff] %v414_v57 }
 0x53c   :  { %420 = vsyncpa [#allocation5], 1 }

</bundles_post_ra>
